<compile_context>
chip_gen: v7x
topology: tpu7x:2x2x1
jax: 0.10.0
libtpu: 0.0.40
codegen_flags: <defaults>
</compile_context>

<pallas_src>
import jax
import jax.numpy as jnp
from jax.experimental import pallas as pl
from jax.experimental.pallas import tpu as pltpu


def _round_up(x, m):
    return ((x + m - 1) // m) * m


def _linear_kernel(x_ref, w_ref, b_ref, o_ref):
    """One (j, b, i) grid step.

    x_ref : (K_p, tm) bf16 block of x kept in its original (C_in, T) layout
    w_ref : (K_p, tn) bf16 block of W^T (input_dim, embed_dim)
    b_ref : (1,  tn)  f32 bias block
    o_ref : (tm, tn)  output block (batch dim squeezed)
    """
    # Contract dim 0 of both operands: x_blk^T @ w_blk -> (tm, tn).
    # Folds the NCT -> NTC transpose into the MXU feed; f32 accumulation.
    acc = jax.lax.dot_general(
        x_ref[...], w_ref[...],
        dimension_numbers=(((0,), (0,)), ((), ())),
        preferred_element_type=jnp.float32,
    )
    # Bias added once; single store per output tile.
    o_ref[...] = (acc + b_ref[...]).astype(o_ref.dtype)


def _pick_tiles(T, C_in, E):
    # tm: rows (seq positions) -- last dim of the x block, so keep it a
    # multiple of 128 (lane-dense) or equal to the full padded T dim.
    tm = 512 if T >= 512 else _round_up(T, 128)
    T_p = _round_up(T, tm)
    # K folded completely into the block (no K grid axis).
    K_p = _round_up(C_in, 128)
    # tn: lane-dense output block, up to 512 wide.
    N_p = _round_up(E, 128)
    if N_p <= 512:
        tn = N_p
    elif N_p % 512 == 0:
        tn = 512
    elif N_p % 256 == 0:
        tn = 256
    else:
        tn = 128
    return (tm, tn), (T_p, K_p, N_p)


@jax.jit
def linear_layer_forward(x, weight, bias):
    """x: (B, input_dim, T); weight: (embed_dim, input_dim); bias: (embed_dim,).

    Returns (B, T, embed_dim) == x.transpose(1, 2) @ weight.T + bias.
    """
    B, C_in, T = x.shape
    E = weight.shape[0]
    out_dtype = x.dtype

    (tm, tn), (T_p, K_p, N_p) = _pick_tiles(T, C_in, E)

    # bf16 operands (native MXU path, half the HBM read bytes); zero padding
    # on K keeps the reduction exact.  All pads are no-ops for the aligned
    # production shape (input_dim=2048, embed_dim=512).
    x_p = jnp.pad(x.astype(jnp.bfloat16),
                  ((0, 0), (0, K_p - C_in), (0, T_p - T)))
    w_p = jnp.pad(weight.astype(jnp.bfloat16).T,
                  ((0, K_p - C_in), (0, N_p - E)))
    b_p = jnp.pad(bias.astype(jnp.float32), ((0, N_p - E),)).reshape(1, N_p)

    # j (N tiles) outermost so the W / bias blocks are fetched once per j and
    # stay VMEM-resident across all (b, i) steps.
    grid = (N_p // tn, B, T_p // tm)

    flops = 2 * B * T_p * N_p * K_p
    bytes_accessed = (2 * B * K_p * T_p      # x read (bf16), once
                      + 2 * K_p * N_p        # W read (bf16), once (resident)
                      + 4 * N_p              # bias
                      + 4 * B * T_p * N_p)   # output (f32), written once

    y_p = pl.pallas_call(
        _linear_kernel,
        out_shape=jax.ShapeDtypeStruct((B, T_p, N_p), out_dtype),
        grid=grid,
        in_specs=[
            # x stays (B, C_in, T): transpose folded into BlockSpec + dot.
            pl.BlockSpec((None, K_p, tm), lambda j, b, i: (b, 0, i)),
            # Weight / bias blocks depend only on j -> VMEM-resident.
            pl.BlockSpec((K_p, tn), lambda j, b, i: (0, j)),
            pl.BlockSpec((1, tn), lambda j, b, i: (0, j)),
        ],
        out_specs=pl.BlockSpec((None, tm, tn), lambda j, b, i: (b, i, j)),
        compiler_params=pltpu.CompilerParams(
            # Every grid step writes a distinct output tile -> fully parallel
            # (shards across v7x's two TensorCores; no-op on v5e/v6e).
            dimension_semantics=("parallel", "parallel", "parallel"),
            # ~10 MiB footprint at production shape; 48 MiB cap leaves
            # headroom on v7x's 64 MiB core.
            vmem_limit_bytes=48 * 1024 * 1024,
        ),
        cost_estimate=pl.CostEstimate(
            flops=flops, transcendentals=0, bytes_accessed=bytes_accessed),
    )(x_p, w_p, b_p)

    # Slice away padding (no-op for aligned shapes).
    return y_p[:, :T, :E]


if __name__ == "__main__":
    # Small shapes consistent with the module's forward; deliberately NOT
    # tile-aligned so the padding path is exercised:
    #   x: (batch=2, input_dim=100, seq=20) -> output (2, 20, 40)
    B, C_in, T, E = 2, 100, 20, 40

    key = jax.random.PRNGKey(0)
    kx, kw, kb = jax.random.split(key, 3)

    x = jax.random.normal(kx, (B, C_in, T), dtype=jnp.float32)
    weight = jax.random.normal(kw, (E, C_in), dtype=jnp.float32) * 0.05
    bias = jax.random.normal(kb, (E,), dtype=jnp.float32) * 0.05

    y = linear_layer_forward(x, weight, bias)
    jax.block_until_ready(y)

    # Reference with the same bf16-operand / f32-accumulation numerics
    # contract as the kernel (same math as the PyTorch forward).
    xq = x.astype(jnp.bfloat16).astype(jnp.float32)
    wq = weight.astype(jnp.bfloat16).astype(jnp.float32)
    y_ref = jnp.einsum("bct,ec->bte", xq, wq) + bias

    assert y.shape == (B, T, E)
    assert jnp.allclose(y, y_ref, atol=2e-2, rtol=2e-2), float(
        jnp.max(jnp.abs(y - y_ref)))

    print("KERNEL_OK")
</pallas_src>

<mosaic_0001>
module attributes {stable_mosaic.version = 11 : i64} {
  func.func @_linear_kernel(%arg0: i32, %arg1: i32, %arg2: i32, %arg3: memref<1x128x128xbf16, #tpu.memory_space<vmem>>, %arg4: memref<128x128xbf16, #tpu.memory_space<vmem>>, %arg5: memref<1x128xf32, #tpu.memory_space<vmem>>, %arg6: memref<1x128x128xf32, #tpu.memory_space<vmem>>) attributes {dimension_semantics = [#tpu.dimension_semantics<parallel>, #tpu.dimension_semantics<parallel>, #tpu.dimension_semantics<parallel>], iteration_bounds = array<i64: 1, 2, 1>, scalar_prefetch = 0 : i64, scratch_operands = 0 : i64, tpu.core_type = #tpu.core_type<tc>, window_params = [{transform_indices = @transform_0, window_bounds = array<i64: 1, 128, 128>}, {transform_indices = @transform_1, window_bounds = array<i64: 128, 128>}, {transform_indices = @transform_2, window_bounds = array<i64: 1, 128>}, {transform_indices = @transform_3, window_bounds = array<i64: 1, 128, 128>}]} {
    %c0 = arith.constant 0 : index
    %c0_0 = arith.constant 0 : index
    %c0_1 = arith.constant 0 : index
    %0 = vector.load %arg3[%c0, %c0_0, %c0_1] : memref<1x128x128xbf16, #tpu.memory_space<vmem>>, vector<1x128x128xbf16>
    %1 = vector.shape_cast %0 : vector<1x128x128xbf16> to vector<128x128xbf16>
    %c0_2 = arith.constant 0 : index
    %c0_3 = arith.constant 0 : index
    %2 = vector.load %arg4[%c0_2, %c0_3] : memref<128x128xbf16, #tpu.memory_space<vmem>>, vector<128x128xbf16>
    %cst = arith.constant dense<0.000000e+00> : vector<128x128xf32>
    %3 = tpu.matmul %1, %2, %cst {dimension_numbers = #tpu.dot_dimension_numbers<[0], [0], [1], [1], [0, 1, 1, 1], [], []>} : vector<128x128xbf16>, vector<128x128xbf16>, vector<128x128xf32> -> vector<128x128xf32>
    %c0_4 = arith.constant 0 : index
    %c0_5 = arith.constant 0 : index
    %4 = vector.load %arg5[%c0_4, %c0_5] : memref<1x128xf32, #tpu.memory_space<vmem>>, vector<1x128xf32>
    %5 = vector.broadcast %4 : vector<1x128xf32> to vector<128x128xf32>
    %6 = arith.addf %3, %5 : vector<128x128xf32>
    %c0_6 = arith.constant 0 : index
    %c0_7 = arith.constant 0 : index
    %c0_8 = arith.constant 0 : index
    %7 = vector.load %arg6[%c0_6, %c0_7, %c0_8] : memref<1x128x128xf32, #tpu.memory_space<vmem>>, vector<1x128x128xf32>
    %8 = vector.shape_cast %7 : vector<1x128x128xf32> to vector<128x128xf32>
    %9 = vector.shape_cast %6 : vector<128x128xf32> to vector<1x128x128xf32>
    tpu.vector_store %arg6[%c0_6, %c0_7, %c0_8], %9 {strides = array<i32>} : memref<1x128x128xf32, #tpu.memory_space<vmem>>, vector<1x128x128xf32>,
    return
  }
  func.func @transform_0(%arg0: i32, %arg1: i32, %arg2: i32) -> (i32, i32, i32) {
    %c0_i32 = arith.constant 0 : i32
    %c0_i32_0 = arith.constant 0 : i32
    return %arg1, %c0_i32, %arg2 : i32, i32, i32
  }
  func.func @transform_1(%arg0: i32, %arg1: i32, %arg2: i32) -> (i32, i32) {
    %c0_i32 = arith.constant 0 : i32
    %c0_i32_0 = arith.constant 0 : i32
    return %c0_i32, %arg0 : i32, i32
  }
  func.func @transform_2(%arg0: i32, %arg1: i32, %arg2: i32) -> (i32, i32) {
    %c0_i32 = arith.constant 0 : i32
    %c0_i32_0 = arith.constant 0 : i32
    return %c0_i32, %arg0 : i32, i32
  }
  func.func @transform_3(%arg0: i32, %arg1: i32, %arg2: i32) -> (i32, i32, i32) {
    %c0_i32 = arith.constant 0 : i32
    return %arg1, %arg2, %arg0 : i32, i32, i32
  }
}

</mosaic_0001>

<bundles_post_ra>
// kernel: linear_layer_forward.1
= control target key start
LH: loop header
LB: loop body
LE: loop exit
PB: predicated region body
PF: predicated region fallthrough
CT: control target
= control target key end

     0   :  { %s823_s12 = smov 0   ;;  %s825_s13 = smov 0   ;;  %s915_s0 = inlined_call_operand.vmem [shape: bf16[2,128,128], index: 0, kind: input, shape index: {}]   ;;  %s916_s1 = inlined_call_operand.vmem [shape: bf16[128,128], index: 1, kind: input, shape index: {}]   ;;  %s917_s2 = inlined_call_operand.vmem [shape: f32[1,128], index: 2, kind: input, shape index: {}]   ;;  %s918_s3 = inlined_call_operand.vmem [shape: f32[2,128,128], index: 3, kind: output, shape index: {}]  }
   0x1   :  { %s827_s14 = smov 0  }
   0x2 LB: > { %s28_s15 = sadd.s32 1, %s797_s13  ;;  %p649_p0 = scmp.ge.s32.totalorder %s801_s14, 1  ;;  %s801_s14 = sphi %s827_s14, %s13_s14   ;;  %s797_s13 = sphi %s825_s13, %s920_s13   ;;  %s793_s12 = sphi %s823_s12, %s919_s12  }
   0x3   : > { %p30_p1 = scmp.ge.s32.totalorder %s28_s15, 2  ;;  %p182_p2 = scmp.lt.s32.totalorder %s801_s14, 3 }
   0x5   : > { %s922_s15 = smov (%p30_p1, %s28_s15), 0  ;;  %p183_p3 = pnand %p649_p0, %p182_p2 }
   0x6   : > { %p223_p4 = scmp.lt.s32.totalorder (!%p183_p3), %s793_s12, 1  ;;  %v771_v0 = vld [vmem:[%s916_s1] sm:$0xff] (!%p183_p3)   ;;  %v772_v1 = vld [vmem:[%s916_s1 + $0x8] sm:$0xff] (!%p183_p3)   ;;  %v773_v2 = vld [vmem:[%s916_s1 + $0x10] sm:$0xff] (!%p183_p3)  }
   0x7   : > { %186 = sbr.rel (%p183_p3) target bundleno = 367 (0x16f), region = 32  ;;  %691 = vmatprep.subr.bf16.mxu0 (!%p183_p3), %v771_v0  ;;  %723 = vmatprep.subr.bf16.mxu1 (!%p183_p3), %v771_v0  ;;  %v774_v4 = vld [vmem:[%s916_s1 + $0x18] sm:$0xff] (!%p183_p3)   ;;  %v775_v6 = vld [vmem:[%s916_s1 + $0x20] sm:$0xff] (!%p183_p3)   ;;  %v776_v9 = vld [vmem:[%s916_s1 + $0x28] sm:$0xff] (!%p183_p3)  }
   0x8   : > { %692 = vmatpush3.bf16.msra.mxu0 (!%p183_p3), %v771_v0  ;;  %731 = vmatpush3.bf16.msra.mxu1 (!%p183_p3), %v771_v0  ;;  %v777_v11 = vld [vmem:[%s916_s1 + $0x30] sm:$0xff] (!%p183_p3)   ;;  %v778_v13 = vld [vmem:[%s916_s1 + $0x38] sm:$0xff] (!%p183_p3)   ;;  %v654_v24 = vld [vmem:[%s917_s2] ss:$0 sm:$0xff] (!%p183_p3) }
   0x9   : > { %693 = vmatprep.subr.bf16.mxu0 (!%p183_p3), %v772_v1  ;;  %724 = vmatprep.subr.bf16.mxu1 (!%p183_p3), %v772_v1 }
   0xc   : > { %694 = vmatpush3.bf16.msra.mxu0 (!%p183_p3), %v772_v1  ;;  %732 = vmatpush3.bf16.msra.mxu1 (!%p183_p3), %v772_v1 }
   0xd   : > { %695 = vmatprep.subr.bf16.mxu0 (!%p183_p3), %v773_v2  ;;  %725 = vmatprep.subr.bf16.mxu1 (!%p183_p3), %v773_v2 }
   0xe   : > { %s924_s12 = smov (!%p223_p4, %s793_s12), 1 }
   0xf   : > { %s673_s20 = sshll.u32 %s924_s12, 6  ;;  %s674_s9 = sshll.u32 %s924_s12, 7 }
  0x10   : > { %s856_s25 = scalar_lea.vmem %s915_s0, %s673_s20  ;;  %696 = vmatpush3.bf16.msra.mxu0 %v773_v2  ;;  %733 = vmatpush3.bf16.msra.mxu1 %v773_v2  ;;  %s888_s18 = scalar_lea.vmem %s918_s3, %s674_s9 }
  0x11   : > { %v763_v3 = vld [vmem:[%s856_s25] sm:$0xff]   ;;  %v764_v5 = vld [vmem:[%s856_s25 + $0x8] sm:$0xff]   ;;  %v765_v7 = vld [vmem:[%s856_s25 + $0x10] sm:$0xff]   ;;  %697 = vmatprep.subr.bf16.mxu0 %v774_v4  ;;  %726 = vmatprep.subr.bf16.mxu1 %v774_v4 }
  0x12   : > { %339 = vxpose.xlu0.c.b16.start [1/8] %v763_v3, 128  ;;  %v766_v8 = vld [vmem:[%s856_s25 + $0x18] sm:$0xff]   ;;  %v767_v10 = vld [vmem:[%s856_s25 + $0x20] sm:$0xff]   ;;  %v768_v12 = vld [vmem:[%s856_s25 + $0x28] sm:$0xff]  }
  0x13   : > { %v769_v14 = vld [vmem:[%s856_s25 + $0x30] sm:$0xff]   ;;  %v770_v15 = vld [vmem:[%s856_s25 + $0x38] sm:$0xff]  }
  0x14   : > { %698 = vmatpush3.bf16.msra.mxu0 %v774_v4  ;;  %734 = vmatpush3.bf16.msra.mxu1 %v774_v4 }
  0x15   : > { %699 = vmatprep.subr.bf16.mxu0 %v775_v6  ;;  %727 = vmatprep.subr.bf16.mxu1 %v775_v6 }
  0x16   : > { %340 = vxpose.xlu0.c.b16.cont [2/8] %v764_v5, 128 }
  0x18   : > { %700 = vmatpush3.bf16.msra.mxu0 %v775_v6  ;;  %735 = vmatpush3.bf16.msra.mxu1 %v775_v6 }
  0x19   : > { %701 = vmatprep.subr.bf16.mxu0 %v776_v9  ;;  %728 = vmatprep.subr.bf16.mxu1 %v776_v9 }
  0x1a   : > { %341 = vxpose.xlu0.c.b16.cont [3/8] %v765_v7, 128 }
  0x1c   : > { %702 = vmatpush3.bf16.msra.mxu0 %v776_v9  ;;  %736 = vmatpush3.bf16.msra.mxu1 %v776_v9 }
  0x1d   : > { %703 = vmatprep.subr.bf16.mxu0 %v777_v11  ;;  %729 = vmatprep.subr.bf16.mxu1 %v777_v11 }
  0x1e   : > { %342 = vxpose.xlu0.c.b16.cont [4/8] %v766_v8, 128 }
  0x20   : > { %704 = vmatpush3.bf16.msra.mxu0 %v777_v11  ;;  %737 = vmatpush3.bf16.msra.mxu1 %v777_v11 }
  0x21   : > { %705 = vmatprep.subr.bf16.mxu0 %v778_v13  ;;  %730 = vmatprep.subr.bf16.mxu1 %v778_v13 }
  0x22   : > { %343 = vxpose.xlu0.c.b16.cont [5/8] %v767_v10, 128 }
  0x24   : > { %706 = vmatpush3.bf16.msra.mxu0 %v778_v13  ;;  %738 = vmatpush3.bf16.msra.mxu1 %v778_v13 }
  0x26   : > { %344 = vxpose.xlu0.c.b16.cont [6/8] %v768_v12, 128 }
  0x2a   : > { %345 = vxpose.xlu0.c.b16.cont [7/8] %v769_v14, 128 }
  0x2e   : > { %346 = vxpose.xlu0.c.b16.end [8/8] %v770_v15, 128 }
  0x78   : > { %v347_v16 = vpop.trf.xlu0 }
  0x79   : > { %707 = vmatprep.mubr.bf16.mxu0 %v347_v16 }
  0x7c   : > { %v348_v17 = vpop.trf.xlu0 }
  0x7d   : > { %708 = vmatmul.mubr.bf16.vlgmr.msra.gmra.mrb[0].mxu0 %v348_v17 }
  0x80   : > { %v349_v18 = vpop.trf.xlu0 }
  0x81   : > { %711 = vmatprep.mubr.bf16.mxu0 %v349_v18 }
  0x84   : > { %v350_v19 = vpop.trf.xlu0 }
  0x85   : > { %712 = vmatmul.mubr.bf16.gmra.mrb[4].mxu0 %v350_v19 }
  0x88   : > { %v351_v20 = vpop.trf.xlu0 }
  0x89   : > { %715 = vmatprep.mubr.bf16.mxu1 %v351_v20 }
  0x8c   : > { %v352_v21 = vpop.trf.xlu0 }
  0x8d   : > { %716 = vmatmul.mubr.bf16.vlgmr.msra.gmra.mrb[0].mxu1 %v352_v21 }
  0x90   : > { %v353_v22 = vpop.trf.xlu0 }
  0x91   : > { %719 = vmatprep.mubr.bf16.mxu1 %v353_v22 }
  0x94   : > { %v354_v23 = vpop.trf.xlu0 }
  0x95   : > { %720 = vmatmul.mubr.bf16.gmra.mrb[4].mxu1 %v354_v23 }
 0x150   : > { %v709_v25 = vpop.f32.mrb[0].mxu0 }
 0x151   : > { %v446_v26 = vadd.f32 %v709_v25, %v654_v24  ;;  %v437_v27 = vpop.f32.mrb[1].mxu0 }
 0x152   : > { %v438_v28 = vadd.f32 %v654_v24, %v437_v27  ;;  %v710_v29 = vpop.f32.mrb[2].mxu0 }
 0x153   : > { %502 = vst [vmem:[%s888_s18 + $0x10] sm:$0xff] %v446_v26  ;;  %v449_v30 = vadd.f32 %v710_v29, %v654_v24  ;;  %v440_v31 = vpop.f32.mrb[3].mxu0 }
 0x154   : > { %500 = vst [vmem:[%s888_s18] sm:$0xff] %v438_v28  ;;  %v441_v32 = vadd.f32 %v654_v24, %v440_v31 }
 0x155   : > { %503 = vst [vmem:[%s888_s18 + $0x18] sm:$0xff] %v449_v30 }
 0x156   : > { %501 = vst [vmem:[%s888_s18 + $0x8] sm:$0xff] %v441_v32 }
 0x158   : > { %v713_v33 = vpop.f32.mrb[4].mxu0 }
 0x159   : > { %v462_v34 = vadd.f32 %v713_v33, %v654_v24  ;;  %v453_v35 = vpop.f32.mrb[5].mxu0 }
 0x15a   : > { %v454_v36 = vadd.f32 %v654_v24, %v453_v35  ;;  %v714_v37 = vpop.f32.mrb[6].mxu0 }
 0x15b   : > { %506 = vst [vmem:[%s888_s18 + $0x30] sm:$0xff] %v462_v34  ;;  %v465_v38 = vadd.f32 %v714_v37, %v654_v24  ;;  %v456_v39 = vpop.f32.mrb[7].mxu0 }
 0x15c   : > { %504 = vst [vmem:[%s888_s18 + $0x20] sm:$0xff] %v454_v36  ;;  %v457_v40 = vadd.f32 %v654_v24, %v456_v39 }
 0x15d   : > { %507 = vst [vmem:[%s888_s18 + $0x38] sm:$0xff] %v465_v38 }
 0x15e   : > { %505 = vst [vmem:[%s888_s18 + $0x28] sm:$0xff] %v457_v40 }
 0x160   : > { %v717_v41 = vpop.f32.mrb[0].mxu1 }
 0x161   : > { %v478_v42 = vadd.f32 %v717_v41, %v654_v24  ;;  %v469_v43 = vpop.f32.mrb[1].mxu1 }
 0x162   : > { %v470_v44 = vadd.f32 %v654_v24, %v469_v43  ;;  %v718_v45 = vpop.f32.mrb[2].mxu1 }
 0x163   : > { %510 = vst [vmem:[%s888_s18 + $0x50] sm:$0xff] %v478_v42  ;;  %v481_v46 = vadd.f32 %v718_v45, %v654_v24  ;;  %v472_v47 = vpop.f32.mrb[3].mxu1 }
 0x164   : > { %508 = vst [vmem:[%s888_s18 + $0x40] sm:$0xff] %v470_v44  ;;  %v473_v48 = vadd.f32 %v654_v24, %v472_v47 }
 0x165   : > { %511 = vst [vmem:[%s888_s18 + $0x58] sm:$0xff] %v481_v46 }
 0x166   : > { %509 = vst [vmem:[%s888_s18 + $0x48] sm:$0xff] %v473_v48 }
 0x168   : > { %v721_v49 = vpop.f32.mrb[4].mxu1 }
 0x169   : > { %v494_v50 = vadd.f32 %v721_v49, %v654_v24  ;;  %v485_v51 = vpop.f32.mrb[5].mxu1 }
 0x16a   : > { %v486_v52 = vadd.f32 %v654_v24, %v485_v51  ;;  %v722_v53 = vpop.f32.mrb[6].mxu1 }
 0x16b   : > { %514 = vst [vmem:[%s888_s18 + $0x70] sm:$0xff] %v494_v50  ;;  %v497_v54 = vadd.f32 %v722_v53, %v654_v24  ;;  %v488_v55 = vpop.f32.mrb[7].mxu1 }
 0x16c   : > { %512 = vst [vmem:[%s888_s18 + $0x60] sm:$0xff] %v486_v52  ;;  %v489_v56 = vadd.f32 %v654_v24, %v488_v55 }
 0x16d   : > { %515 = vst [vmem:[%s888_s18 + $0x78] sm:$0xff] %v497_v54 }
 0x16e   : > { %513 = vst [vmem:[%s888_s18 + $0x68] sm:$0xff] %v489_v56 }
 0x16f PF: > { %s13_s14 = sadd.s32 1, %s801_s14   ;;  %s919_s12 = smov %s797_s13 }
 0x170   : > { %p10_p5 = scmp.ge.s32.totalorder %s13_s14, 4   ;;  %s920_s13 = smov %s922_s15 }
 0x172   :  { %12 = sbr.rel (!%p10_p5) target bundleno = 2 (0x2), region = 68 }

</bundles_post_ra>
